<compile_context>
chip_gen: v7x
topology: tpu7x:2x2x1
jax: 0.10.0
libtpu: 0.0.40
codegen_flags: <defaults>
</compile_context>

<pallas_src>
import jax
import jax.numpy as jnp
from jax.experimental import pallas as pl
from jax.experimental.pallas import tpu as pltpu


def _cat_relu_add_kernel(x1_ref, x2_ref, o_ref):
    """One batch tile: o = [r+x2a, r+x2b, r+x2a, r+x2b], r = relu(x1)."""
    C = x1_ref.shape[1]
    r = jnp.maximum(x1_ref[...], jnp.zeros((), x1_ref.dtype))        # (1, C)
    # C % 128 == 0 -> both slices are full-lane-aligned (no masked loads).
    a = (x2_ref[:, :C] + r).astype(o_ref.dtype)                      # (TB, C)
    b = (x2_ref[:, C:] + r).astype(o_ref.dtype)                      # (TB, C)
    # Four direct, lane-aligned, unmasked stores (no concat temporary).
    o_ref[:, 0 * C:1 * C] = a
    o_ref[:, 2 * C:3 * C] = a
    o_ref[:, 1 * C:2 * C] = b
    o_ref[:, 3 * C:4 * C] = b


def _pick_tb(B, sub, cap):
    """Batch tile size: multiple of the sublane tile, prefers dividing B,
    and yields >=2 grid steps when the whole batch would fit one tile."""
    cap = max(sub, min(cap, 1024))
    if B <= cap:
        # Whole batch fits one tile; split into two clean tiles if possible
        # so the "parallel" axis has work for both v7x TensorCores.
        if B % (2 * sub) == 0:
            return B // 2
        return B  # full-dim block (allowed even if < sublane tile)
    # Largest multiple of `sub` <= cap that divides B -> no masked last block.
    start = cap - (cap % sub)
    for t in range(start, sub - 1, -sub):
        if B % t == 0:
            return t
    return start  # fall back: last block partial (correct, just masked)


def model_forward(x1, x2):
    one, C = x1.shape
    B, twoC = x2.shape
    assert one == 1 and twoC == 2 * C, "x2 feature dim must be 2x x1 feature dim"
    assert C % 128 == 0, "C must be a multiple of 128 for lane-aligned tiles"

    out_dtype = jnp.result_type(x1.dtype, x2.dtype)
    out_bytes = jnp.dtype(out_dtype).itemsize
    x1_bytes = jnp.dtype(x1.dtype).itemsize
    x2_bytes = jnp.dtype(x2.dtype).itemsize

    # Sublane tile of the output dtype (f32 -> 8, bf16 -> 16, int8/fp8 -> 32).
    sub = {4: 8, 2: 16, 1: 32}.get(out_bytes, 8)

    # Double-buffered per-row bytes: one (TB, 2C) input block + one (TB, 4C)
    # output block, x2 buffers. ~8 MiB budget fits all generations' defaults.
    row_bytes = 2 * (2 * C * x2_bytes + 4 * C * out_bytes)
    tb_cap = max(sub, ((8 << 20) // row_bytes) // sub * sub)
    TB = _pick_tb(B, sub, tb_cap)
    grid = (pl.cdiv(B, TB),)

    cost = pl.CostEstimate(
        flops=B * 4 * C + C,                    # one add per output elem + relu(x1)
        transcendentals=0,
        bytes_accessed=C * x1_bytes + B * 2 * C * x2_bytes + B * 4 * C * out_bytes,
    )

    out2d = pl.pallas_call(
        _cat_relu_add_kernel,
        out_shape=jax.ShapeDtypeStruct((B, 4 * C), out_dtype),
        grid=grid,
        in_specs=[
            pl.BlockSpec((1, C), lambda i: (0, 0)),        # x1: VMEM-resident
            pl.BlockSpec((TB, 2 * C), lambda i: (i, 0)),   # x2: one contiguous DMA
        ],
        out_specs=pl.BlockSpec((TB, 4 * C), lambda i: (i, 0)),
        compiler_params=pltpu.CompilerParams(
            dimension_semantics=("parallel",)),
        cost_estimate=cost,
    )(x1, x2)

    # torch .view(-1): row-major flatten of a contiguous (B, 4C) array is a
    # metadata-only reshape in XLA.
    return out2d.reshape(-1)


def _reference(x1, x2):
    v1 = jnp.concatenate((x1, x1), axis=1)
    v2 = jnp.concatenate((v1, v1), axis=1)
    v3 = jax.nn.relu(v2)
    w = jnp.concatenate((x2, x2), axis=1)
    return (v3 + w).reshape(-1)


if __name__ == "__main__":
    key = jax.random.PRNGKey(0)
    k1, k2 = jax.random.split(key)
    # Small, lane-aligned shapes consistent with the module's broadcast
    # requirement (x2 features == 2 * x1 features): x1=(1,128), x2=(8,256).
    x1 = jax.random.normal(k1, (1, 128), dtype=jnp.float32)
    x2 = jax.random.normal(k2, (8, 256), dtype=jnp.float32)

    out = jax.block_until_ready(model_forward(x1, x2))
    ref = _reference(x1, x2)
    assert out.shape == ref.shape == (8 * 512,)
    assert jnp.allclose(out, ref, atol=1e-6, rtol=1e-6)
    print("KERNEL_OK")
</pallas_src>

<mosaic_0001>
module attributes {stable_mosaic.version = 11 : i64} {
  func.func @_cat_relu_add_kernel(%arg0: i32, %arg1: memref<1x128xf32, #tpu.memory_space<vmem>>, %arg2: memref<8x256xf32, #tpu.memory_space<vmem>>, %arg3: memref<8x512xf32, #tpu.memory_space<vmem>>) attributes {dimension_semantics = [#tpu.dimension_semantics<parallel>], iteration_bounds = array<i64: 1>, scalar_prefetch = 0 : i64, scratch_operands = 0 : i64, tpu.core_type = #tpu.core_type<tc>, window_params = [{pipeline_mode = #tpu.pipeline_mode<synchronous>, transform_indices = @transform_0, window_bounds = array<i64: 1, 128>}, {transform_indices = @transform_1, window_bounds = array<i64: 8, 256>}, {transform_indices = @transform_2, window_bounds = array<i64: 8, 512>}]} {
    %c0 = arith.constant 0 : index
    %c0_0 = arith.constant 0 : index
    %0 = vector.load %arg1[%c0, %c0_0] : memref<1x128xf32, #tpu.memory_space<vmem>>, vector<1x128xf32>
    %cst = arith.constant 0.000000e+00 : f32
    %1 = vector.broadcast %cst : f32 to vector<1x128xf32>
    %2 = arith.maximumf %0, %1 : vector<1x128xf32>
    %c0_1 = arith.constant 0 : index
    %c0_2 = arith.constant 0 : index
    %3 = vector.load %arg2[%c0_1, %c0_2] : memref<8x256xf32, #tpu.memory_space<vmem>>, vector<8x128xf32>
    %4 = vector.broadcast %2 : vector<1x128xf32> to vector<8x128xf32>
    %5 = arith.addf %3, %4 : vector<8x128xf32>
    %c0_3 = arith.constant 0 : index
    %c128 = arith.constant 128 : index
    %6 = vector.load %arg2[%c0_3, %c128] : memref<8x256xf32, #tpu.memory_space<vmem>>, vector<8x128xf32>
    %7 = vector.broadcast %2 : vector<1x128xf32> to vector<8x128xf32>
    %8 = arith.addf %6, %7 : vector<8x128xf32>
    %c0_4 = arith.constant 0 : index
    %c0_5 = arith.constant 0 : index
    %9 = vector.load %arg3[%c0_4, %c0_5] : memref<8x512xf32, #tpu.memory_space<vmem>>, vector<8x128xf32>
    tpu.vector_store %arg3[%c0_4, %c0_5], %5 {strides = array<i32>} : memref<8x512xf32, #tpu.memory_space<vmem>>, vector<8x128xf32>,
    %c0_6 = arith.constant 0 : index
    %c256 = arith.constant 256 : index
    %10 = vector.load %arg3[%c0_6, %c256] : memref<8x512xf32, #tpu.memory_space<vmem>>, vector<8x128xf32>
    tpu.vector_store %arg3[%c0_6, %c256], %5 {strides = array<i32>} : memref<8x512xf32, #tpu.memory_space<vmem>>, vector<8x128xf32>,
    %c0_7 = arith.constant 0 : index
    %c128_8 = arith.constant 128 : index
    %11 = vector.load %arg3[%c0_7, %c128_8] : memref<8x512xf32, #tpu.memory_space<vmem>>, vector<8x128xf32>
    tpu.vector_store %arg3[%c0_7, %c128_8], %8 {strides = array<i32>} : memref<8x512xf32, #tpu.memory_space<vmem>>, vector<8x128xf32>,
    %c0_9 = arith.constant 0 : index
    %c384 = arith.constant 384 : index
    %12 = vector.load %arg3[%c0_9, %c384] : memref<8x512xf32, #tpu.memory_space<vmem>>, vector<8x128xf32>
    tpu.vector_store %arg3[%c0_9, %c384], %8 {strides = array<i32>} : memref<8x512xf32, #tpu.memory_space<vmem>>, vector<8x128xf32>,
    return
  }
  func.func @transform_0(%arg0: i32) -> (i32, i32) {
    %c0_i32 = arith.constant 0 : i32
    %c0_i32_0 = arith.constant 0 : i32
    %c0_i32_1 = arith.constant 0 : i32
    return %c0_i32, %c0_i32_0 : i32, i32
  }
  func.func @transform_1(%arg0: i32) -> (i32, i32) {
    %c0_i32 = arith.constant 0 : i32
    %c0_i32_0 = arith.constant 0 : i32
    return %arg0, %c0_i32 : i32, i32
  }
  func.func @transform_2(%arg0: i32) -> (i32, i32) {
    %c0_i32 = arith.constant 0 : i32
    %c0_i32_0 = arith.constant 0 : i32
    return %arg0, %c0_i32 : i32, i32
  }
}

</mosaic_0001>

<bundles_post_ra>
// kernel: tpu_custom_call.1
= control target key start
LH: loop header
LB: loop body
LE: loop exit
PB: predicated region body
PF: predicated region fallthrough
CT: control target
= control target key end

     0   :  { %7 = vsyncpa [#allocation3], 0  ;;  %s197_s0 = inlined_call_operand.hbm [shape: f32[1,128], index: 0, kind: input, shape index: {}]   ;;  %s198_s1 = inlined_call_operand.hbm [shape: f32[8,256], index: 1, kind: input, shape index: {}]   ;;  %s199_s2 = inlined_call_operand.hbm [shape: f32[8,512], index: 2, kind: output, shape index: {}]  }
   0x1   :  { %8 = vsyncpa [#allocation6], 0 }
   0x2   :  { %9 = vsyncpa [#allocation4], 0  ;;  %s143_s9 = smov [#allocation2]   ;;  %s144_s11 = smov [#allocation5]  }
   0x3   :  { %s16_s10 = sshll.u32 %s143_s9, 4  ;;  %s26_s12 = sshll.u32 %s144_s11, 4  ;;  %s17_s10 = int_to_ptr.vmem [resolvable:$true] %s16_s10  ;;  %s27_s12 = int_to_ptr.vmem [resolvable:$true] %s26_s12 }
   0x4   :  { %s71_s15 = scalar_lea.hbm %s197_s0, 16 }
   0x5   :  { %p72_p0 = scmp.ne.s32.totalorder %s197_s0, %s71_s15  ;;  %p75_p1 = scmp.lt.u32.totalorder %s71_s15, %s197_s0 }
   0x7   :  { %p77_p2 = pnand %p75_p1, %p72_p0 }
   0x9   :  { %80 = shalt.err (!%p77_p2)
}
   0xa   :  { %s81_s20 = scalar_lea.vmem %s17_s10, 16  ;;  %s85_s21 = scalar_lea.vmem %s17_s10, 32 }
   0xb   :  { %p82_p3 = scmp.ne.s32.totalorder %s17_s10, %s81_s20  ;;  %p86_p4 = scmp.lt.s32.totalorder %s17_s10, %s17_s10 }
   0xc   :  { %p87_p5 = scmp.lt.s32.totalorder %s85_s21, %s81_s20 }
   0xe   :  { %p88_p6 = por %p87_p5, %p86_p4 }
  0x10   :  { %p89_p7 = pnand %p88_p6, %p82_p3 }
  0x12   :  { %92 = shalt.err (!%p89_p7)
}
  0x13   :  { %19 = dma.hbm_to_vmem [thread:$0]  %s197_s0, 16, %s17_s10, [#allocation3]  }
  0x14   :  { %s93_s26 = scalar_lea.hbm %s198_s1, 256 }
  0x15   :  { %p94_p8 = scmp.ne.s32.totalorder %s198_s1, %s93_s26  ;;  %p97_p9 = scmp.lt.u32.totalorder %s93_s26, %s198_s1 }
  0x17   :  { %p99_p10 = pnand %p97_p9, %p94_p8 }
  0x19   :  { %102 = shalt.err (!%p99_p10)
}
  0x1a   :  { %s103_s3 = scalar_lea.vmem %s27_s12, 256  ;;  %p108_p12 = scmp.lt.s32.totalorder %s27_s12, %s27_s12 }
  0x1b   :  { %p104_p11 = scmp.ne.s32.totalorder %s27_s12, %s103_s3  ;;  %p109_p13 = scmp.lt.s32.totalorder %s103_s3, %s103_s3 }
  0x1d   :  { %p110_p0 = por %p109_p13, %p108_p12 }
  0x1f   :  { %p111_p1 = pnand %p110_p0, %p104_p11 }
  0x21   :  { %114 = shalt.err (!%p111_p1)
}
  0x22   :  { %29 = dma.hbm_to_vmem [thread:$0]  %s198_s1, 256, %s27_s12, [#allocation6]  }
  0x23   :  { %137 = dma.done.wait [#allocation3], 16  }
  0x24   :  { %138 = vsyncadd [#allocation3], 4294967280 }
  0x25   :  { %139 = dma.done.wait [#allocation6], 256  }
  0x26   :  { %140 = vsyncadd [#allocation6], 4294967040  ;;  %v40_v0 = vlaneseq  ;;  %v36_v3 = vld [vmem:[#allocation2] sm:$0x1]  ;;  %v38_v5 = vld [vmem:[#allocation5] sm:$0xff]  ;;  %s145_s5 = smov [#allocation7]  }
  0x27   :  { %v37_v4 = vmax.f32 %v36_v3, 0.0  ;;  %v46_v6 = vld [vmem:[#allocation5 + $0x8] sm:$0xff]  ;;  %s58_s6 = sshll.u32 %s145_s5, 4  ;;  %s59_s6 = int_to_ptr.vmem [resolvable:$true] %s58_s6 }
  0x28   :  { %v41_v1 = vshrl.u32 %v40_v0, 7  ;;  %s115_s1 = scalar_lea.vmem %s59_s6, 512  ;;  %p120_p3 = scmp.lt.s32.totalorder %s59_s6, %s59_s6 }
  0x29   :  { %p116_p2 = scmp.ne.s32.totalorder %s59_s6, %s115_s1  ;;  %p121_p4 = scmp.lt.s32.totalorder %s115_s1, %s115_s1 }
  0x2a   :  { %v42_v2 = vsub.s32 0, %v41_v1 }
  0x2b   :  { %p122_p5 = por %p121_p4, %p120_p3 }
  0x2c   :  { %v43_v7 = vrot.slane %v37_v4, %v42_v2 }
  0x2d   :  { %p123_p6 = pnand %p122_p5, %p116_p2 }
  0x2e   :  { %v45_v8 = vadd.f32 %v43_v7, %v38_v5  ;;  %v47_v9 = vadd.f32 %v46_v6, %v43_v7 }
  0x30   :  { %48 = vst [vmem:[#allocation7] sm:$0xff] %v45_v8  ;;  %49 = vst [vmem:[#allocation7 + $0x10] sm:$0xff] %v45_v8 }
  0x31   :  { %50 = vst [vmem:[#allocation7 + $0x8] sm:$0xff] %v47_v9  ;;  %51 = vst [vmem:[#allocation7 + $0x18] sm:$0xff] %v47_v9 }
  0x32   :  { %126 = shalt.err (!%p123_p6)
}
  0x33   :  { %s127_s9 = scalar_lea.hbm %s199_s2, 512 }
  0x34   :  { %p128_p7 = scmp.ne.s32.totalorder %s199_s2, %s127_s9  ;;  %p131_p8 = scmp.lt.u32.totalorder %s127_s9, %s199_s2 }
  0x36   :  { %p133_p9 = pnand %p131_p8, %p128_p7 }
  0x38   :  { %136 = shalt.err (!%p133_p9)
}
  0x39   :  { %61 = dma.vmem_to_hbm [thread:$0]  %s59_s6, 512, %s199_s2, [#allocation4]  }
  0x3a   :  { %141 = dma.done.wait [#allocation4], 512  }
  0x3b   :  { %142 = vsyncadd [#allocation4], 4294966784 }
  0x3c   :  { %65 = vsyncpa [#allocation3], 1 }
  0x3d   :  { %66 = vsyncpa [#allocation6], 1 }
  0x3e   :  { %67 = vsyncpa [#allocation4], 1 }

</bundles_post_ra>
